<compile_context>
chip_gen: v7x
topology: tpu7x:2x2x1
jax: 0.10.0
libtpu: 0.0.40
codegen_flags: <defaults>
</compile_context>

<pallas_src>
import functools

import jax
import jax.numpy as jnp
import numpy as np
from jax import lax
from jax.experimental import pallas as pl
from jax.experimental.pallas import tpu as pltpu

LANE = 128          # TPU lane width (last-dim vector width)
SUBLANE_BF16 = 16   # bf16 packs two rows per 32-bit sublane


def _round_up(x, m):
    return (x + m - 1) // m * m


def _cdiv(a, b):
    return (a + b - 1) // b


# ----------------------------------------------------------------------------
# Pallas kernel: one (image, pixel-tile) step of the 1x1 conv (matmul + bias)
# ----------------------------------------------------------------------------
def _cblinear_kernel(x_ref, w_ref, b_ref, o_ref):
    """x:(C1p, T) bf16, w:(Coutp, C1p) bf16, b:(Coutp, 1) f32, o:(Coutp, T) bf16."""
    y = jnp.dot(w_ref[...], x_ref[...], preferred_element_type=jnp.float32)
    o_ref[...] = (y + b_ref[...]).astype(o_ref.dtype)


def _pick_tile_hw(hw_padded, n, tile_hw):
    """Pixel-tile width: as large as requested, but keep >= 4 grid steps when
    possible (pipelining depth; both v7x TensorCores get work)."""
    thw = min(_round_up(tile_hw, LANE), hw_padded)
    while thw > LANE and n * _cdiv(hw_padded, thw) < 4:
        new_thw = _round_up(thw // 2, LANE)
        if new_thw == thw:
            break
        thw = new_thw
    return thw


# ----------------------------------------------------------------------------
# Wrapper: NCHW in -> tuple of NCHW splits out (matches CBLinear.forward)
# ----------------------------------------------------------------------------
@functools.partial(jax.jit, static_argnames=("c2s", "tile_hw"))
def cb_linear(x_nchw, weight_oihw, bias, c2s, tile_hw=1024):
    """CBLinear forward: 1x1 conv (bias=True) then split along channels.

    TODO(synk): only the default k=1, s=1, groups=1 configuration is
    implemented (k>1 / grouped conv would need a halo / grouped kernel).
    """
    n, c1, h, w = x_nchw.shape
    cout = weight_oihw.shape[0]
    assert weight_oihw.shape == (cout, c1, 1, 1), "only k=1 supported"
    assert sum(c2s) == cout

    hw = h * w
    c1p = _round_up(c1, SUBLANE_BF16)       # channels -> sublanes (pad to 16)
    coutp = _round_up(cout, SUBLANE_BF16)
    hw128 = _round_up(hw, LANE)             # pixels -> lanes (pad to 128)
    thw = _pick_tile_hw(hw128, n, tile_hw)
    n_hw = _cdiv(hw128, thw)
    hwp = n_hw * thw
    out_dtype = x_nchw.dtype

    # Activations: NCHW -> (N, C1, H*W) is a free view; cast to bf16 BEFORE
    # padding so the padded intermediate is half-size.  Zero-padded channels /
    # pixels contribute exact zeros and are sliced off below.
    x = x_nchw.reshape(n, c1, hw).astype(jnp.bfloat16)
    x = jnp.pad(x, ((0, 0), (0, c1p - c1), (0, hwp - hw)))

    # Weights: OIHW (Cout, C1, 1, 1) -> (Cout, C1); no transpose needed here.
    wmat = weight_oihw.reshape(cout, c1).astype(jnp.bfloat16)
    wmat = jnp.pad(wmat, ((0, coutp - cout), (0, c1p - c1)))
    bvec = jnp.pad(bias.astype(jnp.float32), (0, coutp - cout)).reshape(coutp, 1)

    # VMEM budget: double-buffered x/out tiles + weights + bias, generous
    # headroom, capped at 40 MiB (v7x has 64 MiB physical VMEM per core).
    x_tile_b = c1p * thw * 2
    o_tile_b = coutp * thw * 2
    w_b = coutp * c1p * 2
    b_b = coutp * 4
    need = 2 * (x_tile_b + o_tile_b + w_b + b_b)
    vmem_limit = int(min(max(need + (8 << 20), 16 << 20), 40 << 20))

    flops = 2 * n * hwp * c1p * coutp
    bytes_accessed = (n * c1p * hwp * 2        # x (bf16)
                      + w_b + b_b              # weights + bias
                      + n * coutp * hwp * 2)   # out (bf16)

    out = pl.pallas_call(
        _cblinear_kernel,
        out_shape=jax.ShapeDtypeStruct((n, coutp, hwp), jnp.bfloat16),
        grid=(n, n_hw),
        in_specs=[
            # pixel tile of one image; the N dim is squeezed out of the kernel
            pl.BlockSpec((None, c1p, thw), lambda ni, hi: (ni, 0, hi)),
            # full weight / bias blocks with a constant index_map: fetched once
            # and kept resident in VMEM across all grid steps.
            # (pipeline_mode=pl.Buffered(1) would drop the unused 2nd buffer.)
            pl.BlockSpec((coutp, c1p), lambda ni, hi: (0, 0)),
            pl.BlockSpec((coutp, 1), lambda ni, hi: (0, 0)),
        ],
        out_specs=pl.BlockSpec((None, coutp, thw), lambda ni, hi: (ni, 0, hi)),
        compiler_params=pltpu.CompilerParams(
            dimension_semantics=("parallel", "parallel"),
            vmem_limit_bytes=vmem_limit,
        ),
        cost_estimate=pl.CostEstimate(
            flops=flops, transcendentals=0, bytes_accessed=bytes_accessed),
    )(x, wmat, bvec)

    # Split like torch.split(c2s, dim=1); slicing off channel/pixel padding.
    # Each piece is a fused slice + reshape + cast (no full-tensor transpose).
    splits = []
    off = 0
    for c2 in c2s:
        piece = out[:, off:off + c2, :hw].reshape(n, c2, h, w)
        splits.append(piece.astype(out_dtype))
        off += c2
    return tuple(splits)


# ----------------------------------------------------------------------------
# Pure-JAX reference (mirrors the PyTorch module in f32)
# ----------------------------------------------------------------------------
def reference(x_nchw, weight_oihw, bias, c2s):
    y = lax.conv_general_dilated(
        x_nchw, weight_oihw, (1, 1), ((0, 0), (0, 0)),
        dimension_numbers=("NCHW", "OIHW", "NCHW"))
    y = y + bias[None, :, None, None]
    splits = []
    off = 0
    for c2 in c2s:
        splits.append(y[:, off:off + c2])
        off += c2
    return tuple(splits)


# ----------------------------------------------------------------------------
if __name__ == "__main__":
    N, C1, H, W = 2, 4, 16, 16
    C2S = (4, 8, 16)                    # split sizes; sum(c2s) = 28
    COUT = sum(C2S)

    key = jax.random.PRNGKey(0)
    kx, kw, kb = jax.random.split(key, 3)
    x = jax.random.normal(kx, (N, C1, H, W), jnp.float32)
    weight = jax.random.normal(kw, (COUT, C1, 1, 1), jnp.float32) / np.sqrt(C1)
    bias = 0.1 * jax.random.normal(kb, (COUT,), jnp.float32)

    outs = cb_linear(x, weight, bias, c2s=C2S)
    outs = jax.block_until_ready(outs)

    refs = reference(x, weight, bias, C2S)
    assert len(outs) == len(C2S)
    for o, r, c2 in zip(outs, refs, C2S):
        assert o.shape == (N, c2, H, W)
        # bf16 operands / bf16 output writeback (intentional; see header note),
        # f32 MXU accumulation -> loose-ish tolerance vs the f32 reference.
        np.testing.assert_allclose(np.asarray(o), np.asarray(r),
                                   rtol=2e-2, atol=2e-2)

    print("KERNEL_OK")
</pallas_src>

<mosaic_0001>
module attributes {stable_mosaic.version = 11 : i64} {
  func.func @_cblinear_kernel(%arg0: i32, %arg1: i32, %arg2: memref<1x16x128xbf16, #tpu.memory_space<vmem>>, %arg3: memref<32x16xbf16, #tpu.memory_space<vmem>>, %arg4: memref<32x1xf32, #tpu.memory_space<vmem>>, %arg5: memref<1x32x128xbf16, #tpu.memory_space<vmem>>) attributes {dimension_semantics = [#tpu.dimension_semantics<parallel>, #tpu.dimension_semantics<parallel>], iteration_bounds = array<i64: 2, 2>, scalar_prefetch = 0 : i64, scratch_operands = 0 : i64, tpu.core_type = #tpu.core_type<tc>, window_params = [{transform_indices = @transform_0, window_bounds = array<i64: 1, 16, 128>}, {pipeline_mode = #tpu.pipeline_mode<synchronous>, transform_indices = @transform_1, window_bounds = array<i64: 32, 16>}, {pipeline_mode = #tpu.pipeline_mode<synchronous>, transform_indices = @transform_2, window_bounds = array<i64: 32, 1>}, {transform_indices = @transform_3, window_bounds = array<i64: 1, 32, 128>}]} {
    %c0 = arith.constant 0 : index
    %c0_0 = arith.constant 0 : index
    %0 = vector.load %arg3[%c0, %c0_0] : memref<32x16xbf16, #tpu.memory_space<vmem>>, vector<32x16xbf16>
    %c0_1 = arith.constant 0 : index
    %c0_2 = arith.constant 0 : index
    %c0_3 = arith.constant 0 : index
    %1 = vector.load %arg2[%c0_1, %c0_2, %c0_3] : memref<1x16x128xbf16, #tpu.memory_space<vmem>>, vector<1x16x128xbf16>
    %2 = vector.shape_cast %1 : vector<1x16x128xbf16> to vector<16x128xbf16>
    %cst = arith.constant dense<0.000000e+00> : vector<32x128xf32>
    %3 = tpu.matmul %0, %2, %cst {dimension_numbers = #tpu.dot_dimension_numbers<[1], [0], [0], [1], [0, 0, 1, 1], [], []>} : vector<32x16xbf16>, vector<16x128xbf16>, vector<32x128xf32> -> vector<32x128xf32>
    %c0_4 = arith.constant 0 : index
    %c0_5 = arith.constant 0 : index
    %4 = vector.load %arg4[%c0_4, %c0_5] : memref<32x1xf32, #tpu.memory_space<vmem>>, vector<32x1xf32>
    %5 = vector.broadcast %4 : vector<32x1xf32> to vector<32x128xf32>
    %6 = arith.addf %3, %5 : vector<32x128xf32>
    %7 = arith.truncf %6 : vector<32x128xf32> to vector<32x128xbf16>
    %c0_6 = arith.constant 0 : index
    %c0_7 = arith.constant 0 : index
    %c0_8 = arith.constant 0 : index
    %8 = vector.load %arg5[%c0_6, %c0_7, %c0_8] : memref<1x32x128xbf16, #tpu.memory_space<vmem>>, vector<1x32x128xbf16>
    %9 = vector.shape_cast %8 : vector<1x32x128xbf16> to vector<32x128xbf16>
    %10 = vector.shape_cast %7 : vector<32x128xbf16> to vector<1x32x128xbf16>
    tpu.vector_store %arg5[%c0_6, %c0_7, %c0_8], %10 {strides = array<i32>} : memref<1x32x128xbf16, #tpu.memory_space<vmem>>, vector<1x32x128xbf16>,
    return
  }
  func.func @transform_0(%arg0: i32, %arg1: i32) -> (i32, i32, i32) {
    %c0_i32 = arith.constant 0 : i32
    %c0_i32_0 = arith.constant 0 : i32
    return %arg0, %c0_i32, %arg1 : i32, i32, i32
  }
  func.func @transform_1(%arg0: i32, %arg1: i32) -> (i32, i32) {
    %c0_i32 = arith.constant 0 : i32
    %c0_i32_0 = arith.constant 0 : i32
    %c0_i32_1 = arith.constant 0 : i32
    return %c0_i32, %c0_i32_0 : i32, i32
  }
  func.func @transform_2(%arg0: i32, %arg1: i32) -> (i32, i32) {
    %c0_i32 = arith.constant 0 : i32
    %c0_i32_0 = arith.constant 0 : i32
    %c0_i32_1 = arith.constant 0 : i32
    return %c0_i32, %c0_i32_0 : i32, i32
  }
  func.func @transform_3(%arg0: i32, %arg1: i32) -> (i32, i32, i32) {
    %c0_i32 = arith.constant 0 : i32
    %c0_i32_0 = arith.constant 0 : i32
    return %arg0, %c0_i32, %arg1 : i32, i32, i32
  }
}

</mosaic_0001>

<bundles_post_ra>
// kernel: cb_linear.1
= control target key start
LH: loop header
LB: loop body
LE: loop exit
PB: predicated region body
PF: predicated region fallthrough
CT: control target
= control target key end

     0   :  { %s672_s12 = smov 0   ;;  %s674_s13 = smov 0   ;;  %s788_s0 = inlined_call_operand.vmem [shape: bf16[2,16,256], index: 0, kind: input, shape index: {}]   ;;  %s789_s1 = inlined_call_operand.vmem [shape: bf16[32,16], index: 1, kind: input, shape index: {}]   ;;  %s790_s2 = inlined_call_operand.vmem [shape: f32[32,1], index: 2, kind: input, shape index: {}]   ;;  %s791_s3 = inlined_call_operand.vmem [shape: bf16[2,32,256], index: 3, kind: output, shape index: {}]  }
   0x1   :  { %s676_s14 = smov 0   ;;  %s678_s15 = smov 0  }
   0x2   :  { %s680_s16 = smov 0   ;;  %s682_s17 = smov 0  }
   0x3   :  { %s684_s18 = smov 0  }
   0x4 LB: > { %s22_s19 = sadd.s32 1, %s641_s16  ;;  %s25_s20 = sadd.s32 1, %s645_s17  ;;  %s649_s18 = sphi %s684_s18, %s13_s18   ;;  %s645_s17 = sphi %s682_s17, %s798_s17   ;;  %s641_s16 = sphi %s680_s16, %s797_s16   ;;  %s637_s15 = sphi %s678_s15, %s796_s15   ;;  %s633_s14 = sphi %s676_s14, %s795_s14   ;;  %s629_s13 = sphi %s674_s13, %s794_s13   ;;  %s625_s12 = sphi %s672_s12, %s793_s12  }
   0x5   : > { %p23_p0 = scmp.ge.s32.totalorder %s22_s19, 2  ;;  %s485_s21 = sadd.s32 4294967295, %s649_s18  }
   0x6   : > { %p41_p1 = scmp.ne.s32.totalorder %s629_s13, %s625_s12  ;;  %p42_p2 = scmp.eq.s32.totalorder %s649_s18, 0 }
   0x7   : > { %s800_s19 = smov (%p23_p0, %s22_s19), 0  ;;  %s802_s20 = smov (!%p23_p0, %s25_s20), %s645_s17 }
   0x8   : > { %p27_p3 = scmp.ge.s32.totalorder %s802_s20, 2  ;;  %p115_p4 = scmp.eq.s32.totalorder %s485_s21, 3 }
   0x9   : > { %s30_s22 = ssub.s32 %s641_s16, %s800_s19  ;;  %p43_p5 = por %p42_p2, %p41_p1 }
   0xa   : > { %s804_s20 = smov (%p27_p3, %s802_s20), 0  ;;  %p720_p6 = por %p115_p4, %p41_p1 }
   0xb   : > { %s29_s24 = ssub.s32 %s645_s17, %s804_s20  ;;  %s34_s26 = sadd.s32 1, %s629_s13 }
   0xc   : > { %s31_s25 = sor.u32 %s30_s22, %s29_s24  ;;  %p488_p8 = scmp.ge.s32.totalorder %s649_s18, 4 }
   0xd   : > { %p32_p7 = scmp.eq.s32.totalorder %s31_s25, 0 }
   0xe   : > { %143 = sbr.rel (%p488_p8) target bundleno = 28 (0x1c), region = 24 }
   0xf   : > { %s728_s27 = scalar_select %p32_p7, %s629_s13, %s34_s26  }
  0x15   : > { %146 = sbr.rel (!%p43_p5) target bundleno = 28 (0x1c), region = 28  ;;  %s148_s28 = sand.u32 (%p43_p5), 1, %s629_s13  }
  0x16   : > { %s490_s29 = sshll.u32 (%p43_p5), %s645_s17, 2  ;;  %s489_s30 = sshll.u32 (%p43_p5), %s148_s28, 3 }
  0x17   : > { %s152_s4 = sadd.s32 (%p43_p5), %s641_s16, %s490_s29  ;;  %s150_s9 = scalar_lea.vmem (%p43_p5), [#allocation2], %s489_s30 }
  0x18   : > { %s491_s5 = sshll.u32 (%p43_p5), %s152_s4, 2 }
  0x19   : > { %s154_s8 = scalar_lea.vmem (%p43_p5), %s788_s0, %s491_s5 }
  0x1a   : > { %v170_v0 = vld [vmem:[%s154_s8] sm:$0xf] (%p43_p5)  ;;  %v172_v1 = vld [vmem:[%s154_s8 + $0x8] sm:$0xf] (%p43_p5) }
  0x1b   : > { %171 = vst [vmem:[%s150_s9] sm:$0xf] (%p43_p5), %v170_v0  ;;  %173 = vst [vmem:[%s150_s9 + $0x4] sm:$0xf] (%p43_p5), %v172_v1 }
  0x1c PF: > { %p492_p9 = scmp.ge.s32.totalorder %s649_s18, 1  ;;  %p199_p10 = scmp.lt.s32.totalorder %s649_s18, 5 }
  0x1e   : > { %p200_p11 = pnand %p492_p9, %p199_p10 }
  0x1f   : > { %s206_s10 = sand.u32 (!%p200_p11), 1, %s625_s12   ;;  %v593_v2 = vld [vmem:[%s789_s1] sm:$0xff] (!%p200_p11)   ;;  %vm275_vm0 = vcmask (!%p200_p11), 130048   ;;  %v237_v3 = vld [vmem:[%s790_s2 + $0x10] sm:$0xff] (!%p200_p11)  ;;  %v651_v6 = vmov (!%p200_p11), 0   ;;  %v594_v7 = vld [vmem:[%s789_s1 + $0x8] sm:$0xff] (!%p200_p11)  }
  0x20   : > { %203 = sbr.rel (%p200_p11) target bundleno = 268 (0x10c), region = 69  ;;  %s493_s22 = sshll.u32 (!%p200_p11), %s206_s10, 3  ;;  %529 = vmatprep.mubr.msk.bf16.mxu0 (!%p200_p11), %vm275_vm0, %v593_v2  ;;  %v235_v4 = vld [vmem:[%s790_s2] sm:$0xff] (!%p200_p11)  ;;  %591 = vset.pattern.permute.xlu1 (!%p200_p11), %v651_v6  ;;  %v238_v8 = vld [vmem:[%s790_s2 + $0x18] sm:$0xff] (!%p200_p11)  ;;  %v236_v9 = vld [vmem:[%s790_s2 + $0x8] sm:$0xff] (!%p200_p11) }
  0x21   : > { %s208_s29 = scalar_lea.vmem (!%p200_p11), [#allocation2], %s493_s22  ;;  %590 = vset.pattern.permute.xlu0 (!%p200_p11), %v651_v6  ;;  %251 = vperm.xlu1 (!%p200_p11), %591, %v237_v3   ;;  %s494_s8 = sshll.u32 (!%p200_p11), %s206_s10, 4 }
  0x22   : > { %v592_v5 = vld [vmem:[%s208_s29] sm:$0xff] (!%p200_p11)   ;;  %241 = vperm.xlu0 (!%p200_p11), %590, %v235_v4   ;;  %s227_s9 = scalar_lea.vmem (!%p200_p11), [#allocation3], %s494_s8 }
  0x23   : > { %527 = vmatprep.subr.bf16.mxu0 (!%p200_p11), %v592_v5 }
  0x24   : > { %528 = vmatpush3.bf16.msra.mxu0 (!%p200_p11), %v592_v5 }
  0x25   : > { %256 = vperm.xlu1 (!%p200_p11), %591, %v238_v8  }
  0x26   : > { %246 = vperm.xlu0 (!%p200_p11), %590, %v236_v9  }
  0x27   : > { %530 = vmatmul.mubr.msk.bf16.vlgmr.msra.gmra.mrb[0].mxu0 %vm275_vm0, %v594_v7  ;;  %s505_s11 = sshll.u32 (%p720_p6), %s637_s15, 3 }
  0x28   : > { %s359_s10 = sadd.s32 (%p720_p6), %s633_s14, %s505_s11 }
  0x29   : > { %s506_s21 = sshll.u32 (%p720_p6), %s359_s10, 2 }
  0x2a   : > { %s361_s25 = scalar_lea.vmem (%p720_p6), %s791_s3, %s506_s21 }
  0xa0   : > { %v252_v10 = vpop.permute.xlu1 %251 }
  0xa1   : > { %v242_v11 = vpop.permute.xlu0 %241 }
  0xa4   : > { %v257_v14 = vpop.permute.xlu1 %256 }
  0xa5   : > { %v247_v16 = vpop.permute.xlu0 %246 }
  0xfa   : > { %v531_v12 = vpop.f32.mrb[0].mxu0 }
  0xfb   : > { %v316_v13 = vpop.f32.mrb[1].mxu0  ;;  %v325_v17 = vadd.f32 %v531_v12, %v252_v10 }
  0xfc   : > { %v532_v15 = vpop.f32.mrb[2].mxu0  ;;  %v317_v20 = vadd.f32 %v316_v13, %v242_v11  ;;  %357 = sbr.rel (!%p720_p6) target bundleno = 268 (0x10c), region = 77 }
  0xfd   : > { %v328_v18 = vadd.f32 %v532_v15, %v257_v14  ;;  %v319_v19 = vpop.f32.mrb[3].mxu0 }
  0xfe   : > { %v320_v21 = vadd.f32 %v319_v19, %v247_v16 }
  0xff   : > { %v521_v22 = vpack.c.bf16 %v328_v18, %v325_v17 }
 0x100   : > { %v516_v23 = vpack.c.bf16 %v320_v21, %v317_v20 }
 0x101   : > { %523 = vst [vmem:[%s227_s9 + $0x8] sm:$0xff] %v521_v22  }
 0x102   : > { %517 = vst [vmem:[%s227_s9] sm:$0xff] %v516_v23  }
 0x108   : > { %v381_v26 = vld [vmem:[%s227_s9 + $0x8] sm:$0xf]  ;;  %v383_v27 = vld [vmem:[%s227_s9 + $0xc] sm:$0xf] }
 0x109   : > { %v377_v24 = vld [vmem:[%s227_s9] sm:$0xf]  ;;  %v379_v25 = vld [vmem:[%s227_s9 + $0x4] sm:$0xf]  ;;  %382 = vst [vmem:[%s361_s25 + $0x10] sm:$0xf] %v381_v26 }
 0x10a   : > { %378 = vst [vmem:[%s361_s25] sm:$0xf] %v377_v24  ;;  %380 = vst [vmem:[%s361_s25 + $0x8] sm:$0xf] %v379_v25 }
 0x10b   : > { %384 = vst [vmem:[%s361_s25 + $0x18] sm:$0xf] %v383_v27 }
 0x10c PF: > { %s13_s18 = sadd.s32 1, %s649_s18   ;;  %s793_s12 = smov %s629_s13 }
 0x10d   : > { %p10_p12 = scmp.ge.s32.totalorder %s13_s18, 6   ;;  %s794_s13 = smov %s728_s27 }
 0x10e   : > { %s795_s14 = smov %s641_s16  ;;  %s796_s15 = smov %s645_s17 }
 0x10f   : > { %s797_s16 = smov %s800_s19  ;;  %s798_s17 = smov %s804_s20 }
 0x110   :  { %12 = sbr.rel (!%p10_p12) target bundleno = 4 (0x4), region = 149 }

</bundles_post_ra>
